<compile_context>
chip_gen: v5e
topology: v5e:2x2
jax: 0.10.0
libtpu: 0.0.40
codegen_flags: <defaults>
</compile_context>

<pallas_src>
import functools

import jax
import jax.numpy as jnp
from jax.experimental import pallas as pl
from jax.experimental.pallas import tpu as pltpu


def _round_up(x, m):
    return ((x + m - 1) // m) * m


def _num_tensorcores():
    """2 TensorCores per chip on v7x and megacore (v4/v5p); 1 on v5e/v6e."""
    try:
        kind = jax.devices()[0].device_kind.lower()
    except Exception:
        return 1
    if any(tag in kind for tag in ("v7", "tpu7", "v4", "v5p")):
        return 2
    return 1


def _vmem_capacity_bytes():
    try:
        return int(pltpu.get_tpu_info().vmem_capacity_bytes)
    except Exception:
        return 64 * 2**20  # conservative default (v7x per-TC VMEM)


def _policy_kernel(x_ref, w1_ref, b1_ref, w2_ref, b2_ref, w3_ref, b3_ref,
                   mean_ref, *, output_activation):
    wdt = w1_ref.dtype                       # f32 or bf16 weights
    x = x_ref[...].astype(wdt)

    # affine1 + ReLU  (f32 MXU accumulation, f32 bias/VPU work)
    h1 = jnp.dot(x, w1_ref[...], preferred_element_type=jnp.float32) + b1_ref[...]
    h1 = jnp.maximum(h1, 0.0)

    # affine2 + ReLU
    h2 = jnp.dot(h1.astype(wdt), w2_ref[...],
                 preferred_element_type=jnp.float32) + b2_ref[...]
    h2 = jnp.maximum(h2, 0.0)

    # action_mean head
    mean = jnp.dot(h2.astype(wdt), w3_ref[...],
                   preferred_element_type=jnp.float32) + b3_ref[...]
    if output_activation == "sigmoid":
        mean = jax.nn.sigmoid(mean)
    elif output_activation == "tanh":
        mean = jnp.tanh(mean)

    mean_ref[...] = mean.astype(mean_ref.dtype)


def _build_policy_call(*, B_p, batch_tile, in_size, hid, out,
                       output_activation, vmem_limit, single_buffer_weights):
    kernel = functools.partial(_policy_kernel,
                               output_activation=output_activation)

    def const_spec(shape):
        # Weights/biases: same full block every grid step (kept resident).
        if single_buffer_weights:
            return pl.BlockSpec(shape, lambda i: (0, 0),
                                pipeline_mode=pl.Buffered(1))
        return pl.BlockSpec(shape, lambda i: (0, 0))

    grid = (B_p // batch_tile,)
    return pl.pallas_call(
        kernel,
        out_shape=jax.ShapeDtypeStruct((B_p, out), jnp.float32),
        grid_spec=pltpu.PrefetchScalarGridSpec(
            num_scalar_prefetch=0,
            grid=grid,
            in_specs=[
                pl.BlockSpec((batch_tile, in_size), lambda i: (i, 0)),  # x
                const_spec((in_size, hid)),   # w1
                const_spec((1, hid)),         # b1
                const_spec((hid, hid)),       # w2
                const_spec((1, hid)),         # b2
                const_spec((hid, out)),       # w3
                const_spec((1, out)),         # b3
            ],
            out_specs=pl.BlockSpec((batch_tile, out), lambda i: (i, 0)),
        ),
        compiler_params=pltpu.CompilerParams(
            dimension_semantics=("parallel",),
            vmem_limit_bytes=vmem_limit),
    )


def prepare_policy_params(params, *, weights_dtype=jnp.float32):
    """One-time parameter prep, called OUTSIDE the hot path.

    Optionally casts the weight matrices to bf16 (halves weight HBM/DMA bytes
    on v6e/v7x); biases and log_std stay f32 (used on the f32 accumulator).
    No padding is done -- the kernel consumes the natural shapes directly.
    """
    p = dict(params)
    for k in ("w1", "w2", "w3"):
        p[k] = params[k].astype(weights_dtype)
    return p


def policy_forward(x, params, *, output_activation=None, batch_tile=None):
    """Policy forward pass. Returns (action_mean, action_log_std, action_std),
    each of shape (B, output_size), matching the PyTorch module.

    x: (B, input_size) float32
    params: dict with w1 (in,hid), b1 (1,hid), w2 (hid,hid), b2 (1,hid),
            w3 (hid,out), b3 (1,out), log_std (1,out)  (weights may be bf16)
    """
    B, in_size = x.shape
    hid = params["w1"].shape[1]
    out = params["w3"].shape[1]
    w_item = jnp.dtype(params["w1"].dtype).itemsize

    # ---- batch tiling (generation-aware). Feature dims are never padded; only
    #      batch rows are padded up to a tile multiple when necessary.
    if batch_tile is None:
        n_tc = _num_tensorcores()
        if n_tc == 1:
            # Single TensorCore (v5e/v6e): one big step; tiny tiles buy no
            # DMA overlap here and just add ~0.35us/step overhead.
            batch_tile = min(_round_up(B, 8), 1024)
        else:
            # Two TensorCores (v7x / megacore): even number of steps >= 2 so
            # the "parallel" batch axis splits cleanly across both cores.
            steps = max(2, 2 * pl.cdiv(B, 2 * 1024))
            batch_tile = _round_up(pl.cdiv(B, steps), 8)
    batch_tile = max(8, _round_up(batch_tile, 8))

    B_p = _round_up(B, batch_tile)
    x_in = x if B_p == B else jnp.pad(x, ((0, B_p - B), (0, 0)))

    # ---- VMEM budget (weights conservatively counted double-buffered in case
    #      the single-buffer request is unsupported), capped per generation.
    f32 = 4
    weight_bytes = (in_size * hid + hid * hid + hid * out) * w_item \
                   + (2 * hid + 2 * out) * f32
    io_bytes = 2 * batch_tile * (in_size + out) * f32      # x + mean, 2x buffered
    live_bytes = 2 * batch_tile * hid * f32                # h1 / h2 intermediates
    vmem_needed = 2 * weight_bytes + io_bytes + live_bytes
    vmem_ceiling = int(0.75 * _vmem_capacity_bytes())
    vmem_limit = int(min(max(1.5 * vmem_needed, 16 * 2**20), vmem_ceiling))
    # TODO(synk): add a K-tiled path (hidden-dim grid axis + f32 VMEM
    # accumulator, "arbitrary" semantics) for hidden sizes whose resident
    # weights exceed the VMEM ceiling (mainly v7x's 64 MiB VMEM).

    args = (x_in, params["w1"], params["b1"], params["w2"], params["b2"],
            params["w3"], params["b3"])
    build = functools.partial(
        _build_policy_call, B_p=B_p, batch_tile=batch_tile, in_size=in_size,
        hid=hid, out=out, output_activation=output_activation,
        vmem_limit=vmem_limit)
    try:
        mean = build(single_buffer_weights=True)(*args)
    except Exception:
        # pl.Buffered(1) not supported on this jax build: fall back to default
        # double-buffering (constant index_map => no re-DMA happens anyway).
        mean = build(single_buffer_weights=False)(*args)

    if B_p != B:
        mean = mean[:B]

    # log_std / std do not depend on x: tiny (1,out) exp + broadcast in the
    # wrapper instead of streaming (B,out) arrays through the kernel.
    log_std = params["log_std"].astype(jnp.float32)          # (1, out)
    action_log_std = jnp.broadcast_to(log_std, (B, out))
    action_std = jnp.broadcast_to(jnp.exp(log_std), (B, out))
    return mean, action_log_std, action_std


def init_policy_params(key, state_size, action_size, latent_size,
                       output_size, hidden_size):
    """Deterministic init mirroring nn.Linear defaults + the Policy tweaks."""
    input_size = state_size + action_size + latent_size

    def linear_init(k, fan_in, fan_out):
        kw, kb = jax.random.split(k)
        bound = 1.0 / jnp.sqrt(fan_in)
        # Stored already transposed: (in, out)
        w = jax.random.uniform(kw, (fan_in, fan_out), jnp.float32, -bound, bound)
        b = jax.random.uniform(kb, (1, fan_out), jnp.float32, -bound, bound)
        return w, b

    k1, k2, k3 = jax.random.split(key, 3)
    w1, b1 = linear_init(k1, input_size, hidden_size)
    w2, b2 = linear_init(k2, hidden_size, hidden_size)
    w3, b3 = linear_init(k3, hidden_size, output_size)
    w3 = w3 * 0.1            # action_mean.weight.data.mul_(0.1)
    b3 = b3 * 0.0            # action_mean.bias.data.mul_(0.0)
    log_std = jnp.zeros((1, output_size), jnp.float32)  # nn.Parameter(zeros)

    return {"w1": w1, "b1": b1, "w2": w2, "b2": b2,
            "w3": w3, "b3": b3, "log_std": log_std}


def policy_forward_ref(x, params, output_activation=None):
    h1 = jnp.maximum(x @ params["w1"] + params["b1"], 0.0)
    h2 = jnp.maximum(h1 @ params["w2"] + params["b2"], 0.0)
    mean = h2 @ params["w3"] + params["b3"]
    if output_activation == "sigmoid":
        mean = jax.nn.sigmoid(mean)
    elif output_activation == "tanh":
        mean = jnp.tanh(mean)
    logstd = jnp.broadcast_to(params["log_std"], mean.shape)
    return mean, logstd, jnp.exp(logstd)


if __name__ == "__main__":
    # Small, forward-consistent shapes.
    state_size, action_size, latent_size = 10, 4, 2   # input_size = 16
    hidden_size, output_size = 32, 4
    batch = 64

    key = jax.random.PRNGKey(0)
    kp, kx = jax.random.split(key)
    raw_params = init_policy_params(kp, state_size, action_size, latent_size,
                                    output_size, hidden_size)
    x = jax.random.normal(kx, (batch, state_size + action_size + latent_size),
                          jnp.float32)

    # f32 weights, generation-aware default batch tiling.
    params = prepare_policy_params(raw_params)
    mean, log_std, std = policy_forward(x, params, output_activation=None)
    jax.block_until_ready((mean, log_std, std))

    ref_mean, ref_log_std, ref_std = policy_forward_ref(x, raw_params)
    assert mean.shape == (batch, output_size)
    assert jnp.allclose(mean, ref_mean, atol=1e-5), "mean mismatch"
    assert jnp.allclose(log_std, ref_log_std, atol=1e-6), "log_std mismatch"
    assert jnp.allclose(std, ref_std, atol=1e-6), "std mismatch"

    # Explicit small tile -> multi-step "parallel" grid, non-divisible batch
    # (row padding + slice path), tanh head.
    mean_t, _, _ = policy_forward(x[:50], params, output_activation="tanh",
                                  batch_tile=16)
    ref_t, _, _ = policy_forward_ref(x[:50], raw_params,
                                     output_activation="tanh")
    jax.block_until_ready(mean_t)
    assert mean_t.shape == (50, output_size)
    assert jnp.allclose(mean_t, ref_t, atol=1e-5), "tanh mean mismatch"

    # bf16 weights (halves weight HBM traffic; f32 accumulation in-kernel).
    params_bf16 = prepare_policy_params(raw_params, weights_dtype=jnp.bfloat16)
    mean_b, _, _ = policy_forward(x, params_bf16)
    jax.block_until_ready(mean_b)
    assert jnp.allclose(mean_b, ref_mean, atol=3e-2), "bf16 mean mismatch"

    print("KERNEL_OK")
</pallas_src>

<mosaic_0001>
module attributes {stable_mosaic.version = 11 : i64} {
  func.func @_policy_kernel(%arg0: i32, %arg1: memref<64x16xf32, #tpu.memory_space<vmem>>, %arg2: memref<16x32xf32, #tpu.memory_space<vmem>>, %arg3: memref<1x32xf32, #tpu.memory_space<vmem>>, %arg4: memref<32x32xf32, #tpu.memory_space<vmem>>, %arg5: memref<1x32xf32, #tpu.memory_space<vmem>>, %arg6: memref<32x4xf32, #tpu.memory_space<vmem>>, %arg7: memref<1x4xf32, #tpu.memory_space<vmem>>, %arg8: memref<64x4xf32, #tpu.memory_space<vmem>>) attributes {dimension_semantics = [#tpu.dimension_semantics<parallel>], iteration_bounds = array<i64: 1>, scalar_prefetch = 0 : i64, scratch_operands = 0 : i64, tpu.core_type = #tpu.core_type<tc>, window_params = [{transform_indices = @transform_0, window_bounds = array<i64: 64, 16>}, {pipeline_mode = #tpu.pipeline_mode<synchronous>, transform_indices = @transform_1, window_bounds = array<i64: 16, 32>}, {pipeline_mode = #tpu.pipeline_mode<synchronous>, transform_indices = @transform_2, window_bounds = array<i64: 1, 32>}, {pipeline_mode = #tpu.pipeline_mode<synchronous>, transform_indices = @transform_3, window_bounds = array<i64: 32, 32>}, {pipeline_mode = #tpu.pipeline_mode<synchronous>, transform_indices = @transform_4, window_bounds = array<i64: 1, 32>}, {pipeline_mode = #tpu.pipeline_mode<synchronous>, transform_indices = @transform_5, window_bounds = array<i64: 32, 4>}, {pipeline_mode = #tpu.pipeline_mode<synchronous>, transform_indices = @transform_6, window_bounds = array<i64: 1, 4>}, {transform_indices = @transform_7, window_bounds = array<i64: 64, 4>}]} {
    %c0 = arith.constant 0 : index
    %c0_0 = arith.constant 0 : index
    %0 = vector.load %arg1[%c0, %c0_0] : memref<64x16xf32, #tpu.memory_space<vmem>>, vector<64x16xf32>
    %c0_1 = arith.constant 0 : index
    %c0_2 = arith.constant 0 : index
    %1 = vector.load %arg2[%c0_1, %c0_2] : memref<16x32xf32, #tpu.memory_space<vmem>>, vector<16x32xf32>
    %cst = arith.constant dense<0.000000e+00> : vector<64x32xf32>
    %2 = tpu.matmul %0, %1, %cst {dimension_numbers = #tpu.dot_dimension_numbers<[1], [0], [0], [1], [0, 0, 1, 1], [], []>} : vector<64x16xf32>, vector<16x32xf32>, vector<64x32xf32> -> vector<64x32xf32>
    %c0_3 = arith.constant 0 : index
    %c0_4 = arith.constant 0 : index
    %3 = vector.load %arg3[%c0_3, %c0_4] : memref<1x32xf32, #tpu.memory_space<vmem>>, vector<1x32xf32>
    %4 = vector.broadcast %3 : vector<1x32xf32> to vector<64x32xf32>
    %5 = arith.addf %2, %4 : vector<64x32xf32>
    %cst_5 = arith.constant 0.000000e+00 : f32
    %6 = vector.broadcast %cst_5 : f32 to vector<64x32xf32>
    %7 = arith.maximumf %5, %6 : vector<64x32xf32>
    %c0_6 = arith.constant 0 : index
    %c0_7 = arith.constant 0 : index
    %8 = vector.load %arg4[%c0_6, %c0_7] : memref<32x32xf32, #tpu.memory_space<vmem>>, vector<32x32xf32>
    %cst_8 = arith.constant dense<0.000000e+00> : vector<64x32xf32>
    %9 = tpu.matmul %7, %8, %cst_8 {dimension_numbers = #tpu.dot_dimension_numbers<[1], [0], [0], [1], [0, 0, 1, 1], [], []>} : vector<64x32xf32>, vector<32x32xf32>, vector<64x32xf32> -> vector<64x32xf32>
    %c0_9 = arith.constant 0 : index
    %c0_10 = arith.constant 0 : index
    %10 = vector.load %arg5[%c0_9, %c0_10] : memref<1x32xf32, #tpu.memory_space<vmem>>, vector<1x32xf32>
    %11 = vector.broadcast %10 : vector<1x32xf32> to vector<64x32xf32>
    %12 = arith.addf %9, %11 : vector<64x32xf32>
    %cst_11 = arith.constant 0.000000e+00 : f32
    %13 = vector.broadcast %cst_11 : f32 to vector<64x32xf32>
    %14 = arith.maximumf %12, %13 : vector<64x32xf32>
    %c0_12 = arith.constant 0 : index
    %c0_13 = arith.constant 0 : index
    %15 = vector.load %arg6[%c0_12, %c0_13] : memref<32x4xf32, #tpu.memory_space<vmem>>, vector<32x4xf32>
    %cst_14 = arith.constant dense<0.000000e+00> : vector<64x4xf32>
    %16 = tpu.matmul %14, %15, %cst_14 {dimension_numbers = #tpu.dot_dimension_numbers<[1], [0], [0], [1], [0, 0, 1, 1], [], []>} : vector<64x32xf32>, vector<32x4xf32>, vector<64x4xf32> -> vector<64x4xf32>
    %c0_15 = arith.constant 0 : index
    %c0_16 = arith.constant 0 : index
    %17 = vector.load %arg7[%c0_15, %c0_16] : memref<1x4xf32, #tpu.memory_space<vmem>>, vector<1x4xf32>
    %18 = vector.broadcast %17 : vector<1x4xf32> to vector<64x4xf32>
    %19 = arith.addf %16, %18 : vector<64x4xf32>
    %c0_17 = arith.constant 0 : index
    %c0_18 = arith.constant 0 : index
    %20 = vector.load %arg8[%c0_17, %c0_18] : memref<64x4xf32, #tpu.memory_space<vmem>>, vector<64x4xf32>
    tpu.vector_store %arg8[%c0_17, %c0_18], %19 {strides = array<i32>} : memref<64x4xf32, #tpu.memory_space<vmem>>, vector<64x4xf32>,
    return
  }
  func.func @transform_0(%arg0: i32) -> (i32, i32) {
    %c0_i32 = arith.constant 0 : i32
    %c0_i32_0 = arith.constant 0 : i32
    return %arg0, %c0_i32 : i32, i32
  }
  func.func @transform_1(%arg0: i32) -> (i32, i32) {
    %c0_i32 = arith.constant 0 : i32
    %c0_i32_0 = arith.constant 0 : i32
    %c0_i32_1 = arith.constant 0 : i32
    return %c0_i32, %c0_i32_0 : i32, i32
  }
  func.func @transform_2(%arg0: i32) -> (i32, i32) {
    %c0_i32 = arith.constant 0 : i32
    %c0_i32_0 = arith.constant 0 : i32
    %c0_i32_1 = arith.constant 0 : i32
    return %c0_i32, %c0_i32_0 : i32, i32
  }
  func.func @transform_3(%arg0: i32) -> (i32, i32) {
    %c0_i32 = arith.constant 0 : i32
    %c0_i32_0 = arith.constant 0 : i32
    %c0_i32_1 = arith.constant 0 : i32
    return %c0_i32, %c0_i32_0 : i32, i32
  }
  func.func @transform_4(%arg0: i32) -> (i32, i32) {
    %c0_i32 = arith.constant 0 : i32
    %c0_i32_0 = arith.constant 0 : i32
    %c0_i32_1 = arith.constant 0 : i32
    return %c0_i32, %c0_i32_0 : i32, i32
  }
  func.func @transform_5(%arg0: i32) -> (i32, i32) {
    %c0_i32 = arith.constant 0 : i32
    %c0_i32_0 = arith.constant 0 : i32
    %c0_i32_1 = arith.constant 0 : i32
    return %c0_i32, %c0_i32_0 : i32, i32
  }
  func.func @transform_6(%arg0: i32) -> (i32, i32) {
    %c0_i32 = arith.constant 0 : i32
    %c0_i32_0 = arith.constant 0 : i32
    %c0_i32_1 = arith.constant 0 : i32
    return %c0_i32, %c0_i32_0 : i32, i32
  }
  func.func @transform_7(%arg0: i32) -> (i32, i32) {
    %c0_i32 = arith.constant 0 : i32
    %c0_i32_0 = arith.constant 0 : i32
    return %arg0, %c0_i32 : i32, i32
  }
}

module attributes {stable_mosaic.version = 11 : i64} {
  func.func @_policy_kernel(%arg0: i32, %arg1: memref<64x16xf32, #tpu.memory_space<vmem>>, %arg2: memref<16x32xf32, #tpu.memory_space<vmem>>, %arg3: memref<1x32xf32, #tpu.memory_space<vmem>>, %arg4: memref<32x32xf32, #tpu.memory_space<vmem>>, %arg5: memref<1x32xf32, #tpu.memory_space<vmem>>, %arg6: memref<32x4xf32, #tpu.memory_space<vmem>>, %arg7: memref<1x4xf32, #tpu.memory_space<vmem>>, %arg8: memref<64x4xf32, #tpu.memory_space<vmem>>) attributes {dimension_semantics = [#tpu.dimension_semantics<parallel>], iteration_bounds = array<i64: 1>, scalar_prefetch = 0 : i64, scratch_operands = 0 : i64, tpu.core_type = #tpu.core_type<tc>, window_params = [{transform_indices = @transform_0, window_bounds = array<i64: 64, 16>}, {pipeline_mode = #tpu.pipeline_mode<synchronous>, transform_indices = @transform_1, window_bounds = array<i64: 16, 32>}, {pipeline_mode = #tpu.pipeline_mode<synchronous>, transform_indices = @transform_2, window_bounds = array<i64: 1, 32>}, {pipeline_mode = #tpu.pipeline_mode<synchronous>, transform_indices = @transform_3, window_bounds = array<i64: 32, 32>}, {pipeline_mode = #tpu.pipeline_mode<synchronous>, transform_indices = @transform_4, window_bounds = array<i64: 1, 32>}, {pipeline_mode = #tpu.pipeline_mode<synchronous>, transform_indices = @transform_5, window_bounds = array<i64: 32, 4>}, {pipeline_mode = #tpu.pipeline_mode<synchronous>, transform_indices = @transform_6, window_bounds = array<i64: 1, 4>}, {transform_indices = @transform_7, window_bounds = array<i64: 64, 4>}]} {
    %c0 = arith.constant 0 : index
    %c0_0 = arith.constant 0 : index
    %0 = vector.load %arg1[%c0, %c0_0] : memref<64x16xf32, #tpu.memory_space<vmem>>, vector<64x16xf32>
    %c0_1 = arith.constant 0 : index
    %c0_2 = arith.constant 0 : index
    %1 = vector.load %arg2[%c0_1, %c0_2] : memref<16x32xf32, #tpu.memory_space<vmem>>, vector<16x32xf32>
    %cst = arith.constant dense<0.000000e+00> : vector<64x32xf32>
    %2 = tpu.matmul %0, %1, %cst {dimension_numbers = #tpu.dot_dimension_numbers<[1], [0], [0], [1], [0, 0, 1, 1], [], []>} : vector<64x16xf32>, vector<16x32xf32>, vector<64x32xf32> -> vector<64x32xf32>
    %c0_3 = arith.constant 0 : index
    %c0_4 = arith.constant 0 : index
    %3 = vector.load %arg3[%c0_3, %c0_4] : memref<1x32xf32, #tpu.memory_space<vmem>>, vector<1x32xf32>
    %4 = vector.broadcast %3 : vector<1x32xf32> to vector<64x32xf32>
    %5 = arith.addf %2, %4 : vector<64x32xf32>
    %cst_5 = arith.constant 0.000000e+00 : f32
    %6 = vector.broadcast %cst_5 : f32 to vector<64x32xf32>
    %7 = arith.maximumf %5, %6 : vector<64x32xf32>
    %c0_6 = arith.constant 0 : index
    %c0_7 = arith.constant 0 : index
    %8 = vector.load %arg4[%c0_6, %c0_7] : memref<32x32xf32, #tpu.memory_space<vmem>>, vector<32x32xf32>
    %cst_8 = arith.constant dense<0.000000e+00> : vector<64x32xf32>
    %9 = tpu.matmul %7, %8, %cst_8 {dimension_numbers = #tpu.dot_dimension_numbers<[1], [0], [0], [1], [0, 0, 1, 1], [], []>} : vector<64x32xf32>, vector<32x32xf32>, vector<64x32xf32> -> vector<64x32xf32>
    %c0_9 = arith.constant 0 : index
    %c0_10 = arith.constant 0 : index
    %10 = vector.load %arg5[%c0_9, %c0_10] : memref<1x32xf32, #tpu.memory_space<vmem>>, vector<1x32xf32>
    %11 = vector.broadcast %10 : vector<1x32xf32> to vector<64x32xf32>
    %12 = arith.addf %9, %11 : vector<64x32xf32>
    %cst_11 = arith.constant 0.000000e+00 : f32
    %13 = vector.broadcast %cst_11 : f32 to vector<64x32xf32>
    %14 = arith.maximumf %12, %13 : vector<64x32xf32>
    %c0_12 = arith.constant 0 : index
    %c0_13 = arith.constant 0 : index
    %15 = vector.load %arg6[%c0_12, %c0_13] : memref<32x4xf32, #tpu.memory_space<vmem>>, vector<32x4xf32>
    %cst_14 = arith.constant dense<0.000000e+00> : vector<64x4xf32>
    %16 = tpu.matmul %14, %15, %cst_14 {dimension_numbers = #tpu.dot_dimension_numbers<[1], [0], [0], [1], [0, 0, 1, 1], [], []>} : vector<64x32xf32>, vector<32x4xf32>, vector<64x4xf32> -> vector<64x4xf32>
    %c0_15 = arith.constant 0 : index
    %c0_16 = arith.constant 0 : index
    %17 = vector.load %arg7[%c0_15, %c0_16] : memref<1x4xf32, #tpu.memory_space<vmem>>, vector<1x4xf32>
    %18 = vector.broadcast %17 : vector<1x4xf32> to vector<64x4xf32>
    %19 = arith.addf %16, %18 : vector<64x4xf32>
    %c0_17 = arith.constant 0 : index
    %c0_18 = arith.constant 0 : index
    %20 = vector.load %arg8[%c0_17, %c0_18] : memref<64x4xf32, #tpu.memory_space<vmem>>, vector<64x4xf32>
    tpu.vector_store %arg8[%c0_17, %c0_18], %19 {strides = array<i32>} : memref<64x4xf32, #tpu.memory_space<vmem>>, vector<64x4xf32>,
    return
  }
  func.func @transform_0(%arg0: i32) -> (i32, i32) {
    %c0_i32 = arith.constant 0 : i32
    %c0_i32_0 = arith.constant 0 : i32
    return %arg0, %c0_i32 : i32, i32
  }
  func.func @transform_1(%arg0: i32) -> (i32, i32) {
    %c0_i32 = arith.constant 0 : i32
    %c0_i32_0 = arith.constant 0 : i32
    %c0_i32_1 = arith.constant 0 : i32
    return %c0_i32, %c0_i32_0 : i32, i32
  }
  func.func @transform_2(%arg0: i32) -> (i32, i32) {
    %c0_i32 = arith.constant 0 : i32
    %c0_i32_0 = arith.constant 0 : i32
    %c0_i32_1 = arith.constant 0 : i32
    return %c0_i32, %c0_i32_0 : i32, i32
  }
  func.func @transform_3(%arg0: i32) -> (i32, i32) {
    %c0_i32 = arith.constant 0 : i32
    %c0_i32_0 = arith.constant 0 : i32
    %c0_i32_1 = arith.constant 0 : i32
    return %c0_i32, %c0_i32_0 : i32, i32
  }
  func.func @transform_4(%arg0: i32) -> (i32, i32) {
    %c0_i32 = arith.constant 0 : i32
    %c0_i32_0 = arith.constant 0 : i32
    %c0_i32_1 = arith.constant 0 : i32
    return %c0_i32, %c0_i32_0 : i32, i32
  }
  func.func @transform_5(%arg0: i32) -> (i32, i32) {
    %c0_i32 = arith.constant 0 : i32
    %c0_i32_0 = arith.constant 0 : i32
    %c0_i32_1 = arith.constant 0 : i32
    return %c0_i32, %c0_i32_0 : i32, i32
  }
  func.func @transform_6(%arg0: i32) -> (i32, i32) {
    %c0_i32 = arith.constant 0 : i32
    %c0_i32_0 = arith.constant 0 : i32
    %c0_i32_1 = arith.constant 0 : i32
    return %c0_i32, %c0_i32_0 : i32, i32
  }
  func.func @transform_7(%arg0: i32) -> (i32, i32) {
    %c0_i32 = arith.constant 0 : i32
    %c0_i32_0 = arith.constant 0 : i32
    return %arg0, %c0_i32 : i32, i32
  }
}

</mosaic_0001>

<bundles_post_ra>
// kernel: tpu_custom_call.1
= control target key start
LH: loop header
LB: loop body
LE: loop exit
PB: predicated region body
PF: predicated region fallthrough
CT: control target
= control target key end

     0   :  { %vm40_vm0 = vcmask 130048   ;;  %vm122_vm1 = vcmask 261120   ;;  %vm269_vm2 = vcmask 31744   ;;  %s478_s1 = inlined_call_operand.vmem [shape: f32[16,32], index: 1, kind: input, shape index: {}]   ;;  %s479_s0 = inlined_call_operand.vmem [shape: f32[64,16], index: 0, kind: input, shape index: {}]   ;;  %s480_s2 = inlined_call_operand.vmem [shape: f32[1,32], index: 2, kind: input, shape index: {}]   ;;  %s481_s3 = inlined_call_operand.vmem [shape: f32[32,32], index: 3, kind: input, shape index: {}]   ;;  %s482_s4 = inlined_call_operand.vmem [shape: f32[1,32], index: 4, kind: input, shape index: {}]   ;;  %s483_s5 = inlined_call_operand.vmem [shape: f32[32,4], index: 5, kind: input, shape index: {}]   ;;  %s484_s6 = inlined_call_operand.vmem [shape: f32[1,4], index: 6, kind: input, shape index: {}]   ;;  %s485_s7 = inlined_call_operand.vmem [shape: f32[64,4], index: 7, kind: output, shape index: {}]  }
   0x1   :  { %v35_v0 = vld [vmem:[%s478_s1 + $0x8] sm:$0xff]  ;;  %v34_v1 = vld [vmem:[%s478_s1] sm:$0xff]  ;;  %v28_v4 = vld [vmem:[%s479_s0 + $0x10] sm:$0xff] }
   0x2   :  { %79 = vmatpush.msra.mxu0 %v35_v0  ;;  %v26_v2 = vld [vmem:[%s479_s0] sm:$0xff]  ;;  %306 = vmatpush.msra.mxu3 %v35_v0  ;;  %v27_v3 = vld [vmem:[%s479_s0 + $0x8] sm:$0xff]  ;;  %v33_v5 = vld [vmem:[%s479_s0 + $0x38] sm:$0xff] }
   0x3   :  { %v117_v6 = vld [vmem:[%s481_s3 + $0x18] sm:$0xff]  ;;  %v30_v8 = vld [vmem:[%s479_s0 + $0x20] sm:$0xff]  ;;  %v31_v9 = vld [vmem:[%s479_s0 + $0x28] sm:$0xff] }
   0x4   :  { %80 = vmatpush.msra.mxu0 %v34_v1  ;;  %307 = vmatpush.msra.mxu3 %v34_v1  ;;  %v29_v7 = vld [vmem:[%s479_s0 + $0x18] sm:$0xff]  ;;  %v32_v10 = vld [vmem:[%s479_s0 + $0x30] sm:$0xff]  ;;  %v115_v12 = vld [vmem:[%s481_s3 + $0x8] sm:$0xff] }
   0x5   :  { %282 = vmatmul.msk.f32.vlgmr.msra.gmra.mxu0 %vm40_vm0, %v26_v2  ;;  %289 = vmatmul.msk.f32.vlgmr.msra.gmra.mxu3 %vm40_vm0, %v33_v5  ;;  %v116_v11 = vld [vmem:[%s481_s3 + $0x10] sm:$0xff]  ;;  %v114_v13 = vld [vmem:[%s481_s3] sm:$0xff]  ;;  %v199_v27 = vld [vmem:[%s483_s5 + $0x18] sm:$0xff] }
   0x6   :  { %159 = vmatpush.msra.mxu1 %v117_v6  ;;  %308 = vmatpush.msrb.mxu3 %v117_v6  ;;  %v316_v14 = vld [vmem:[%s480_s2] ss:$0 sm:$0xff]  ;;  %v198_v40 = vld [vmem:[%s483_s5 + $0x10] sm:$0xff]  ;;  %v197_v41 = vld [vmem:[%s483_s5 + $0x8] sm:$0xff] }
   0x7   :  { %240 = vmatpush.msra.mxu2 %v199_v27  ;;  %v196_v42 = vld [vmem:[%s483_s5] sm:$0xff] }
   0x8   :  { %160 = vmatpush.msra.mxu1 %v116_v11  ;;  %309 = vmatpush.msrb.mxu3 %v116_v11  ;;  %v317_v43 = vld [vmem:[%s482_s4] ss:$0 sm:$0xff] }
   0x9   :  { %241 = vmatpush.msra.mxu2 %v198_v40 }
   0xa   :  { %161 = vmatpush.msra.mxu1 %v115_v12  ;;  %310 = vmatpush.msrb.mxu3 %v115_v12 }
   0xb   :  { %242 = vmatpush.msra.mxu2 %v197_v41 }
   0xc   :  { %162 = vmatpush.msra.mxu1 %v114_v13  ;;  %311 = vmatpush.msrb.mxu3 %v114_v13 }
   0xd   :  { %283 = vmatmul.msk.f32.gmra.mxu0 %vm40_vm0, %v27_v3  ;;  %243 = vmatpush.msra.mxu2 %v196_v42 }
   0xe   :  { %312 = vmatpush.msra.mxu3 %v199_v27 }
  0x10   :  { %313 = vmatpush.msra.mxu3 %v198_v40 }
  0x12   :  { %314 = vmatpush.msra.mxu3 %v197_v41 }
  0x14   :  { %315 = vmatpush.msra.mxu3 %v196_v42 }
  0x15   :  { %284 = vmatmul.msk.f32.gmra.mxu0 %vm40_vm0, %v28_v4  ;;  %v318_v4 = vld [vmem:[%s484_s6] ss:$0 sm:$0xff] }
  0x1d   :  { %285 = vmatmul.msk.f32.gmra.mxu0 %vm40_vm0, %v29_v7 }
  0x25   :  { %286 = vmatmul.msk.f32.gmra.mxu0 %vm40_vm0, %v30_v8 }
  0x2d   :  { %287 = vmatmul.msk.f32.gmra.mxu0 %vm40_vm0, %v31_v9 }
  0x35   :  { %288 = vmatmul.msk.f32.gmra.mxu0 %vm40_vm0, %v32_v10 }
  0x82   :  { %v82_v15 = vpop.f32.mrf.mxu0 }
  0x83   :  { %v83_v16 = vadd.f32 %v316_v14, %v82_v15 }
  0x85   :  { %v106_v17 = vmax.f32 %v83_v16, 0.0 }
  0x87   :  { %290 = vmatmul.msk.f32.vlgmr.msra.gmra.mxu1 %vm122_vm1, %v106_v17 }
  0x88   :  { %v103_v36 = vpop.f32.mrf.mxu3 }
  0x89   :  { %v104_v38 = vadd.f32 %v316_v14, %v103_v36 }
  0x8a   :  { %v85_v18 = vpop.f32.mrf.mxu0 }
  0x8b   :  { %v86_v19 = vadd.f32 %v316_v14, %v85_v18  ;;  %v113_v39 = vmax.f32 %v104_v38, 0.0 }
  0x8d   :  { %v107_v20 = vmax.f32 %v86_v19, 0.0 }
  0x8f   :  { %291 = vmatmul.msk.f32.gmra.mxu1 %vm122_vm1, %v107_v20 }
  0x92   :  { %v88_v21 = vpop.f32.mrf.mxu0 }
  0x93   :  { %v89_v22 = vadd.f32 %v316_v14, %v88_v21 }
  0x95   :  { %v108_v23 = vmax.f32 %v89_v22, 0.0 }
  0x97   :  { %292 = vmatmul.msk.f32.gmra.mxu1 %vm122_vm1, %v108_v23 }
  0x9a   :  { %v91_v24 = vpop.f32.mrf.mxu0 }
  0x9b   :  { %v92_v25 = vadd.f32 %v316_v14, %v91_v24 }
  0x9d   :  { %v109_v26 = vmax.f32 %v92_v25, 0.0 }
  0x9f   :  { %293 = vmatmul.msk.f32.gmra.mxu1 %vm122_vm1, %v109_v26 }
  0xa2   :  { %v94_v28 = vpop.f32.mrf.mxu0 }
  0xa3   :  { %v95_v29 = vadd.f32 %v316_v14, %v94_v28 }
  0xa5   :  { %v110_v30 = vmax.f32 %v95_v29, 0.0 }
  0xa7   :  { %294 = vmatmul.msk.f32.gmra.mxu1 %vm122_vm1, %v110_v30 }
  0xaa   :  { %v97_v31 = vpop.f32.mrf.mxu0 }
  0xab   :  { %v98_v32 = vadd.f32 %v316_v14, %v97_v31 }
  0xad   :  { %v111_v33 = vmax.f32 %v98_v32, 0.0 }
  0xaf   :  { %295 = vmatmul.msk.f32.gmra.mxu1 %vm122_vm1, %v111_v33 }
  0xb2   :  { %v100_v34 = vpop.f32.mrf.mxu0 }
  0xb3   :  { %v101_v35 = vadd.f32 %v316_v14, %v100_v34 }
  0xb5   :  { %v112_v37 = vmax.f32 %v101_v35, 0.0 }
  0xb7   :  { %296 = vmatmul.msk.f32.vlgmr.msrb.gmra.mxu3 %vm122_vm1, %v112_v37 }
  0xbf   :  { %297 = vmatmul.msk.f32.gmra.mxu3 %vm122_vm1, %v113_v39 }
 0x104   :  { %v164_v44 = vpop.f32.mrf.mxu1 }
 0x105   :  { %v165_v45 = vadd.f32 %v317_v43, %v164_v44 }
 0x107   :  { %v188_v46 = vmax.f32 %v165_v45, 0.0 }
 0x109   :  { %298 = vmatmul.msk.f32.vlgmr.msra.gmra.mxu2 %vm122_vm1, %v188_v46 }
 0x10c   :  { %v167_v47 = vpop.f32.mrf.mxu1 }
 0x10d   :  { %v168_v48 = vadd.f32 %v317_v43, %v167_v47 }
 0x10f   :  { %v189_v49 = vmax.f32 %v168_v48, 0.0 }
 0x111   :  { %299 = vmatmul.msk.f32.gmra.mxu2 %vm122_vm1, %v189_v49 }
 0x114   :  { %v170_v50 = vpop.f32.mrf.mxu1 }
 0x115   :  { %v171_v51 = vadd.f32 %v317_v43, %v170_v50 }
 0x117   :  { %v190_v52 = vmax.f32 %v171_v51, 0.0 }
 0x119   :  { %300 = vmatmul.msk.f32.gmra.mxu2 %vm122_vm1, %v190_v52 }
 0x11c   :  { %v173_v53 = vpop.f32.mrf.mxu1 }
 0x11d   :  { %v174_v54 = vadd.f32 %v317_v43, %v173_v53 }
 0x11f   :  { %v191_v55 = vmax.f32 %v174_v54, 0.0 }
 0x121   :  { %301 = vmatmul.msk.f32.gmra.mxu2 %vm122_vm1, %v191_v55 }
 0x124   :  { %v176_v56 = vpop.f32.mrf.mxu1 }
 0x125   :  { %v177_v57 = vadd.f32 %v317_v43, %v176_v56 }
 0x127   :  { %v192_v58 = vmax.f32 %v177_v57, 0.0 }
 0x129   :  { %302 = vmatmul.msk.f32.gmra.mxu2 %vm122_vm1, %v192_v58 }
 0x12c   :  { %v179_v59 = vpop.f32.mrf.mxu1 }
 0x12d   :  { %v180_v60 = vadd.f32 %v317_v43, %v179_v59 }
 0x12f   :  { %v193_v61 = vmax.f32 %v180_v60, 0.0 }
 0x131   :  { %303 = vmatmul.msk.f32.gmra.mxu2 %vm122_vm1, %v193_v61 }
 0x13a   :  { %v182_v62 = vpop.f32.mrf.mxu3 }
 0x13b   :  { %v183_v63 = vadd.f32 %v317_v43, %v182_v62 }
 0x13d   :  { %v194_v0 = vmax.f32 %v183_v63, 0.0 }
 0x13f   :  { %304 = vmatmul.msk.f32.vlgmr.msra.gmra.mxu3 %vm122_vm1, %v194_v0 }
 0x142   :  { %v185_v1 = vpop.f32.mrf.mxu3 }
 0x143   :  { %v186_v2 = vadd.f32 %v317_v43, %v185_v1 }
 0x145   :  { %v195_v3 = vmax.f32 %v186_v2, 0.0 }
 0x147   :  { %305 = vmatmul.msk.f32.gmra.mxu3 %vm122_vm1, %v195_v3 }
 0x18c   :  { %v245_v5 = vpop.f32.mrf.mxu2 }
 0x18d   :  { %v246_v6 = vadd.f32 %v318_v4, %v245_v5 }
 0x18f   :  { %270 = vst.msk [vmem:[%s485_s7] sm:$0xff] %vm269_vm2, %v246_v6 }
 0x194   :  { %v248_v7 = vpop.f32.mrf.mxu2 }
 0x195   :  { %v249_v8 = vadd.f32 %v318_v4, %v248_v7 }
 0x197   :  { %271 = vst.msk [vmem:[%s485_s7 + $0x8] sm:$0xff] %vm269_vm2, %v249_v8 }
 0x19c   :  { %v251_v9 = vpop.f32.mrf.mxu2 }
 0x19d   :  { %v252_v10 = vadd.f32 %v318_v4, %v251_v9 }
 0x19f   :  { %272 = vst.msk [vmem:[%s485_s7 + $0x10] sm:$0xff] %vm269_vm2, %v252_v10 }
 0x1a4   :  { %v254_v11 = vpop.f32.mrf.mxu2 }
 0x1a5   :  { %v255_v12 = vadd.f32 %v318_v4, %v254_v11 }
 0x1a7   :  { %273 = vst.msk [vmem:[%s485_s7 + $0x18] sm:$0xff] %vm269_vm2, %v255_v12 }
 0x1ac   :  { %v257_v13 = vpop.f32.mrf.mxu2 }
 0x1ad   :  { %v258_v14 = vadd.f32 %v318_v4, %v257_v13 }
 0x1af   :  { %274 = vst.msk [vmem:[%s485_s7 + $0x20] sm:$0xff] %vm269_vm2, %v258_v14 }
 0x1b4   :  { %v260_v15 = vpop.f32.mrf.mxu2 }
 0x1b5   :  { %v261_v16 = vadd.f32 %v318_v4, %v260_v15 }
 0x1b7   :  { %275 = vst.msk [vmem:[%s485_s7 + $0x28] sm:$0xff] %vm269_vm2, %v261_v16 }
 0x1c2   :  { %v263_v17 = vpop.f32.mrf.mxu3 }
 0x1c3   :  { %v264_v18 = vadd.f32 %v318_v4, %v263_v17 }
 0x1c5   :  { %276 = vst.msk [vmem:[%s485_s7 + $0x30] sm:$0xff] %vm269_vm2, %v264_v18 }
 0x1ca   :  { %v266_v19 = vpop.f32.mrf.mxu3 }
 0x1cb   :  { %v267_v20 = vadd.f32 %v318_v4, %v266_v19 }
 0x1cd   :  { %277 = vst.msk [vmem:[%s485_s7 + $0x38] sm:$0xff] %vm269_vm2, %v267_v20 }

// kernel: tpu_custom_call.1
= control target key start
LH: loop header
LB: loop body
LE: loop exit
PB: predicated region body
PF: predicated region fallthrough
CT: control target
= control target key end

     0   :  { %vm40_vm0 = vcmask 130048   ;;  %vm122_vm1 = vcmask 261120   ;;  %vm269_vm2 = vcmask 31744   ;;  %s478_s1 = inlined_call_operand.vmem [shape: f32[16,32], index: 1, kind: input, shape index: {}]   ;;  %s479_s0 = inlined_call_operand.vmem [shape: f32[64,16], index: 0, kind: input, shape index: {}]   ;;  %s480_s2 = inlined_call_operand.vmem [shape: f32[1,32], index: 2, kind: input, shape index: {}]   ;;  %s481_s3 = inlined_call_operand.vmem [shape: f32[32,32], index: 3, kind: input, shape index: {}]   ;;  %s482_s4 = inlined_call_operand.vmem [shape: f32[1,32], index: 4, kind: input, shape index: {}]   ;;  %s483_s5 = inlined_call_operand.vmem [shape: f32[32,4], index: 5, kind: input, shape index: {}]   ;;  %s484_s6 = inlined_call_operand.vmem [shape: f32[1,4], index: 6, kind: input, shape index: {}]   ;;  %s485_s7 = inlined_call_operand.vmem [shape: f32[64,4], index: 7, kind: output, shape index: {}]  }
   0x1   :  { %v35_v0 = vld [vmem:[%s478_s1 + $0x8] sm:$0xff]  ;;  %v34_v1 = vld [vmem:[%s478_s1] sm:$0xff]  ;;  %v28_v4 = vld [vmem:[%s479_s0 + $0x10] sm:$0xff] }
   0x2   :  { %79 = vmatpush.msra.mxu0 %v35_v0  ;;  %v26_v2 = vld [vmem:[%s479_s0] sm:$0xff]  ;;  %306 = vmatpush.msra.mxu3 %v35_v0  ;;  %v27_v3 = vld [vmem:[%s479_s0 + $0x8] sm:$0xff]  ;;  %v33_v5 = vld [vmem:[%s479_s0 + $0x38] sm:$0xff] }
   0x3   :  { %v117_v6 = vld [vmem:[%s481_s3 + $0x18] sm:$0xff]  ;;  %v30_v8 = vld [vmem:[%s479_s0 + $0x20] sm:$0xff]  ;;  %v31_v9 = vld [vmem:[%s479_s0 + $0x28] sm:$0xff] }
   0x4   :  { %80 = vmatpush.msra.mxu0 %v34_v1  ;;  %307 = vmatpush.msra.mxu3 %v34_v1  ;;  %v29_v7 = vld [vmem:[%s479_s0 + $0x18] sm:$0xff]  ;;  %v32_v10 = vld [vmem:[%s479_s0 + $0x30] sm:$0xff]  ;;  %v115_v12 = vld [vmem:[%s481_s3 + $0x8] sm:$0xff] }
   0x5   :  { %282 = vmatmul.msk.f32.vlgmr.msra.gmra.mxu0 %vm40_vm0, %v26_v2  ;;  %289 = vmatmul.msk.f32.vlgmr.msra.gmra.mxu3 %vm40_vm0, %v33_v5  ;;  %v116_v11 = vld [vmem:[%s481_s3 + $0x10] sm:$0xff]  ;;  %v114_v13 = vld [vmem:[%s481_s3] sm:$0xff]  ;;  %v199_v27 = vld [vmem:[%s483_s5 + $0x18] sm:$0xff] }
   0x6   :  { %159 = vmatpush.msra.mxu1 %v117_v6  ;;  %308 = vmatpush.msrb.mxu3 %v117_v6  ;;  %v316_v14 = vld [vmem:[%s480_s2] ss:$0 sm:$0xff]  ;;  %v198_v40 = vld [vmem:[%s483_s5 + $0x10] sm:$0xff]  ;;  %v197_v41 = vld [vmem:[%s483_s5 + $0x8] sm:$0xff] }
   0x7   :  { %240 = vmatpush.msra.mxu2 %v199_v27  ;;  %v196_v42 = vld [vmem:[%s483_s5] sm:$0xff] }
   0x8   :  { %160 = vmatpush.msra.mxu1 %v116_v11  ;;  %309 = vmatpush.msrb.mxu3 %v116_v11  ;;  %v317_v43 = vld [vmem:[%s482_s4] ss:$0 sm:$0xff] }
   0x9   :  { %241 = vmatpush.msra.mxu2 %v198_v40 }
   0xa   :  { %161 = vmatpush.msra.mxu1 %v115_v12  ;;  %310 = vmatpush.msrb.mxu3 %v115_v12 }
   0xb   :  { %242 = vmatpush.msra.mxu2 %v197_v41 }
   0xc   :  { %162 = vmatpush.msra.mxu1 %v114_v13  ;;  %311 = vmatpush.msrb.mxu3 %v114_v13 }
   0xd   :  { %283 = vmatmul.msk.f32.gmra.mxu0 %vm40_vm0, %v27_v3  ;;  %243 = vmatpush.msra.mxu2 %v196_v42 }
   0xe   :  { %312 = vmatpush.msra.mxu3 %v199_v27 }
  0x10   :  { %313 = vmatpush.msra.mxu3 %v198_v40 }
  0x12   :  { %314 = vmatpush.msra.mxu3 %v197_v41 }
  0x14   :  { %315 = vmatpush.msra.mxu3 %v196_v42 }
  0x15   :  { %284 = vmatmul.msk.f32.gmra.mxu0 %vm40_vm0, %v28_v4  ;;  %v318_v4 = vld [vmem:[%s484_s6] ss:$0 sm:$0xff] }
  0x1d   :  { %285 = vmatmul.msk.f32.gmra.mxu0 %vm40_vm0, %v29_v7 }
  0x25   :  { %286 = vmatmul.msk.f32.gmra.mxu0 %vm40_vm0, %v30_v8 }
  0x2d   :  { %287 = vmatmul.msk.f32.gmra.mxu0 %vm40_vm0, %v31_v9 }
  0x35   :  { %288 = vmatmul.msk.f32.gmra.mxu0 %vm40_vm0, %v32_v10 }
  0x82   :  { %v82_v15 = vpop.f32.mrf.mxu0 }
  0x83   :  { %v83_v16 = vadd.f32 %v316_v14, %v82_v15 }
  0x85   :  { %v106_v17 = vmax.f32 %v83_v16, 0.0 }
  0x87   :  { %290 = vmatmul.msk.f32.vlgmr.msra.gmra.mxu1 %vm122_vm1, %v106_v17 }
  0x88   :  { %v103_v36 = vpop.f32.mrf.mxu3 }
  0x89   :  { %v104_v38 = vadd.f32 %v316_v14, %v103_v36 }
  0x8a   :  { %v85_v18 = vpop.f32.mrf.mxu0 }
  0x8b   :  { %v86_v19 = vadd.f32 %v316_v14, %v85_v18  ;;  %v113_v39 = vmax.f32 %v104_v38, 0.0 }
  0x8d   :  { %v107_v20 = vmax.f32 %v86_v19, 0.0 }
  0x8f   :  { %291 = vmatmul.msk.f32.gmra.mxu1 %vm122_vm1, %v107_v20 }
  0x92   :  { %v88_v21 = vpop.f32.mrf.mxu0 }
  0x93   :  { %v89_v22 = vadd.f32 %v316_v14, %v88_v21 }
  0x95   :  { %v108_v23 = vmax.f32 %v89_v22, 0.0 }
  0x97   :  { %292 = vmatmul.msk.f32.gmra.mxu1 %vm122_vm1, %v108_v23 }
  0x9a   :  { %v91_v24 = vpop.f32.mrf.mxu0 }
  0x9b   :  { %v92_v25 = vadd.f32 %v316_v14, %v91_v24 }
  0x9d   :  { %v109_v26 = vmax.f32 %v92_v25, 0.0 }
  0x9f   :  { %293 = vmatmul.msk.f32.gmra.mxu1 %vm122_vm1, %v109_v26 }
  0xa2   :  { %v94_v28 = vpop.f32.mrf.mxu0 }
  0xa3   :  { %v95_v29 = vadd.f32 %v316_v14, %v94_v28 }
  0xa5   :  { %v110_v30 = vmax.f32 %v95_v29, 0.0 }
  0xa7   :  { %294 = vmatmul.msk.f32.gmra.mxu1 %vm122_vm1, %v110_v30 }
  0xaa   :  { %v97_v31 = vpop.f32.mrf.mxu0 }
  0xab   :  { %v98_v32 = vadd.f32 %v316_v14, %v97_v31 }
  0xad   :  { %v111_v33 = vmax.f32 %v98_v32, 0.0 }
  0xaf   :  { %295 = vmatmul.msk.f32.gmra.mxu1 %vm122_vm1, %v111_v33 }
  0xb2   :  { %v100_v34 = vpop.f32.mrf.mxu0 }
  0xb3   :  { %v101_v35 = vadd.f32 %v316_v14, %v100_v34 }
  0xb5   :  { %v112_v37 = vmax.f32 %v101_v35, 0.0 }
  0xb7   :  { %296 = vmatmul.msk.f32.vlgmr.msrb.gmra.mxu3 %vm122_vm1, %v112_v37 }
  0xbf   :  { %297 = vmatmul.msk.f32.gmra.mxu3 %vm122_vm1, %v113_v39 }
 0x104   :  { %v164_v44 = vpop.f32.mrf.mxu1 }
 0x105   :  { %v165_v45 = vadd.f32 %v317_v43, %v164_v44 }
 0x107   :  { %v188_v46 = vmax.f32 %v165_v45, 0.0 }
 0x109   :  { %298 = vmatmul.msk.f32.vlgmr.msra.gmra.mxu2 %vm122_vm1, %v188_v46 }
 0x10c   :  { %v167_v47 = vpop.f32.mrf.mxu1 }
 0x10d   :  { %v168_v48 = vadd.f32 %v317_v43, %v167_v47 }
 0x10f   :  { %v189_v49 = vmax.f32 %v168_v48, 0.0 }
 0x111   :  { %299 = vmatmul.msk.f32.gmra.mxu2 %vm122_vm1, %v189_v49 }
 0x114   :  { %v170_v50 = vpop.f32.mrf.mxu1 }
 0x115   :  { %v171_v51 = vadd.f32 %v317_v43, %v170_v50 }
 0x117   :  { %v190_v52 = vmax.f32 %v171_v51, 0.0 }
 0x119   :  { %300 = vmatmul.msk.f32.gmra.mxu2 %vm122_vm1, %v190_v52 }
 0x11c   :  { %v173_v53 = vpop.f32.mrf.mxu1 }
 0x11d   :  { %v174_v54 = vadd.f32 %v317_v43, %v173_v53 }
 0x11f   :  { %v191_v55 = vmax.f32 %v174_v54, 0.0 }
 0x121   :  { %301 = vmatmul.msk.f32.gmra.mxu2 %vm122_vm1, %v191_v55 }
 0x124   :  { %v176_v56 = vpop.f32.mrf.mxu1 }
 0x125   :  { %v177_v57 = vadd.f32 %v317_v43, %v176_v56 }
 0x127   :  { %v192_v58 = vmax.f32 %v177_v57, 0.0 }
 0x129   :  { %302 = vmatmul.msk.f32.gmra.mxu2 %vm122_vm1, %v192_v58 }
 0x12c   :  { %v179_v59 = vpop.f32.mrf.mxu1 }
 0x12d   :  { %v180_v60 = vadd.f32 %v317_v43, %v179_v59 }
 0x12f   :  { %v193_v61 = vmax.f32 %v180_v60, 0.0 }
 0x131   :  { %303 = vmatmul.msk.f32.gmra.mxu2 %vm122_vm1, %v193_v61 }
 0x13a   :  { %v182_v62 = vpop.f32.mrf.mxu3 }
 0x13b   :  { %v183_v63 = vadd.f32 %v317_v43, %v182_v62 }
 0x13d   :  { %v194_v0 = vmax.f32 %v183_v63, 0.0 }
 0x13f   :  { %304 = vmatmul.msk.f32.vlgmr.msra.gmra.mxu3 %vm122_vm1, %v194_v0 }
 0x142   :  { %v185_v1 = vpop.f32.mrf.mxu3 }
 0x143   :  { %v186_v2 = vadd.f32 %v317_v43, %v185_v1 }
 0x145   :  { %v195_v3 = vmax.f32 %v186_v2, 0.0 }
 0x147   :  { %305 = vmatmul.msk.f32.gmra.mxu3 %vm122_vm1, %v195_v3 }
 0x18c   :  { %v245_v5 = vpop.f32.mrf.mxu2 }
 0x18d   :  { %v246_v6 = vadd.f32 %v318_v4, %v245_v5 }
 0x18f   :  { %270 = vst.msk [vmem:[%s485_s7] sm:$0xff] %vm269_vm2, %v246_v6 }
 0x194   :  { %v248_v7 = vpop.f32.mrf.mxu2 }
 0x195   :  { %v249_v8 = vadd.f32 %v318_v4, %v248_v7 }
 0x197   :  { %271 = vst.msk [vmem:[%s485_s7 + $0x8] sm:$0xff] %vm269_vm2, %v249_v8 }
 0x19c   :  { %v251_v9 = vpop.f32.mrf.mxu2 }
 0x19d   :  { %v252_v10 = vadd.f32 %v318_v4, %v251_v9 }
 0x19f   :  { %272 = vst.msk [vmem:[%s485_s7 + $0x10] sm:$0xff] %vm269_vm2, %v252_v10 }
 0x1a4   :  { %v254_v11 = vpop.f32.mrf.mxu2 }
 0x1a5   :  { %v255_v12 = vadd.f32 %v318_v4, %v254_v11 }
 0x1a7   :  { %273 = vst.msk [vmem:[%s485_s7 + $0x18] sm:$0xff] %vm269_vm2, %v255_v12 }
 0x1ac   :  { %v257_v13 = vpop.f32.mrf.mxu2 }
 0x1ad   :  { %v258_v14 = vadd.f32 %v318_v4, %v257_v13 }
 0x1af   :  { %274 = vst.msk [vmem:[%s485_s7 + $0x20] sm:$0xff] %vm269_vm2, %v258_v14 }
 0x1b4   :  { %v260_v15 = vpop.f32.mrf.mxu2 }
 0x1b5   :  { %v261_v16 = vadd.f32 %v318_v4, %v260_v15 }
 0x1b7   :  { %275 = vst.msk [vmem:[%s485_s7 + $0x28] sm:$0xff] %vm269_vm2, %v261_v16 }
 0x1c2   :  { %v263_v17 = vpop.f32.mrf.mxu3 }
 0x1c3   :  { %v264_v18 = vadd.f32 %v318_v4, %v263_v17 }
 0x1c5   :  { %276 = vst.msk [vmem:[%s485_s7 + $0x30] sm:$0xff] %vm269_vm2, %v264_v18 }
 0x1ca   :  { %v266_v19 = vpop.f32.mrf.mxu3 }
 0x1cb   :  { %v267_v20 = vadd.f32 %v318_v4, %v266_v19 }
 0x1cd   :  { %277 = vst.msk [vmem:[%s485_s7 + $0x38] sm:$0xff] %vm269_vm2, %v267_v20 }

</bundles_post_ra>
